<compile_context>
chip_gen: v5e
topology: v5e:2x2
jax: 0.10.0
libtpu: 0.0.40
codegen_flags: <defaults>
</compile_context>

<pallas_src>
import jax
import jax.numpy as jnp
from jax.experimental import pallas as pl
from jax.experimental.pallas import tpu as pltpu


def _round_up(x, m):
    return (x + m - 1) // m * m


def _pad2(a, rows, cols):
    pr, pc = rows - a.shape[0], cols - a.shape[1]
    if pr == 0 and pc == 0:
        return a
    return jnp.pad(a, ((0, pr), (0, pc)))


def _pick_tile(dim_p, max_tile):
    """Largest multiple of 128 that divides dim_p and is <= max_tile (min 128)."""
    best = 128
    t = 128
    limit = min(dim_p, max_tile)
    while t <= limit:
        if dim_p % t == 0:
            best = t
        t += 128
    return best


def _vmem_capacity_bytes():
    try:
        info = pltpu.get_tpu_info()
        cap = getattr(info, "vmem_capacity_bytes", None)
        if cap:
            return int(cap)
    except Exception:
        pass
    return 64 << 20  # conservative (v7x-sized) fallback


def fc_block_kernel(x_ref, w1_ref, b1_ref, w2_ref, b2_ref, o_ref, h_ref):
    j = pl.program_id(1)
    k = pl.program_id(2)
    nk = pl.num_programs(2)
    tk = w1_ref.shape[0]

    # ---- GEMM 1: h = x @ W1 + b1, accumulated over K-slices in f32 scratch.
    # Runs only on the first output-column tile (j == 0); h is reused for
    # every W2 column tile of the current row tile.
    @pl.when(jnp.logical_and(j == 0, k == 0))
    def _init_h():
        h_ref[...] = jnp.broadcast_to(b1_ref[...], h_ref.shape)

    @pl.when(j == 0)
    def _gemm1():
        kk = pl.multiple_of(k * tk, tk)
        x_k = x_ref[:, pl.ds(kk, tk)]
        h_ref[...] += jnp.dot(x_k, w1_ref[...],
                              preferred_element_type=jnp.float32)

    # ---- GEMM 2 + bias + ReLU once h is complete (last K-slice).
    @pl.when(k == nk - 1)
    def _gemm2():
        y = jnp.dot(h_ref[...].astype(w2_ref.dtype), w2_ref[...],
                    preferred_element_type=jnp.float32)
        y = y + b2_ref[...]
        o_ref[...] = jnp.maximum(y, 0.0).astype(o_ref.dtype)


def prepare_fc_params(w1, b1, w2, b2, *, compute_dtype=jnp.bfloat16):
    """Pad + cast the weights once (call at model-init time, not per forward)."""
    in_dim, hid_dim = w1.shape
    assert w2.shape[0] == hid_dim
    out_dim = w2.shape[1]
    in_p = _round_up(in_dim, 128)
    hid_p = _round_up(hid_dim, 128)
    out_p = _round_up(out_dim, 128)
    return dict(
        w1=_pad2(w1, in_p, hid_p).astype(compute_dtype),
        b1=_pad2(jnp.reshape(b1, (1, -1)), 1, hid_p).astype(jnp.float32),
        w2=_pad2(w2, hid_p, out_p).astype(compute_dtype),
        b2=_pad2(jnp.reshape(b2, (1, -1)), 1, out_p).astype(jnp.float32),
        in_dim=in_dim, hid_dim=hid_dim, out_dim=out_dim)


def fc_block_apply(params, x, *, tm=None, tn=None, tk=None):
    w1_p, b1_p = params["w1"], params["b1"]
    w2_p, b2_p = params["w2"], params["b2"]
    in_dim, out_dim = params["in_dim"], params["out_dim"]
    in_p, hid_p = w1_p.shape
    out_p = w2_p.shape[1]
    compute_dtype = w1_p.dtype
    out_dtype = x.dtype
    csize = jnp.dtype(compute_dtype).itemsize
    osize = jnp.dtype(out_dtype).itemsize

    B = x.shape[0]
    assert x.shape[1] == in_dim
    B_128 = _round_up(B, 128)

    # --- Generation-aware tile defaults and VMEM budget.
    vmem_cap = _vmem_capacity_bytes()
    big_vmem = vmem_cap > (96 << 20)          # v5e/v6e: 128 MiB, v7x: 64 MiB
    if big_vmem:
        tm_d, tn_d, tk_d, budget = 512, 512, 512, 100 << 20
    else:
        tm_d, tn_d, tk_d, budget = 256, 256, 512, 48 << 20
    tm = tm_d if tm is None else tm
    tn_max = tn_d if tn is None else tn
    tk_max = tk_d if tk is None else tk

    tm = max(128, min(_round_up(tm, 128), B_128))
    # v7x megacore: make sure the second TensorCore gets at least one row tile.
    if (not big_vmem) and B_128 >= 256 and B_128 // tm < 2:
        tm = _round_up(B_128 // 2, 128)
    tn = _pick_tile(out_p, tn_max)
    tk = _pick_tile(in_p, tk_max)

    def vmem_needed(tm_, tn_, tk_):
        return (tm_ * in_p * csize            # x row tile (single-buffered)
                + 2 * tk_ * hid_p * csize     # W1 K-slice (double-buffered)
                + 2 * hid_p * tn_ * csize     # W2 column tile (double-buffered)
                + 2 * tm_ * tn_ * osize       # output tile (double-buffered)
                + tm_ * hid_p * 4             # f32 h accumulator scratch
                + hid_p * 4 + 2 * tn_ * 4)    # biases

    # Shrink tiles until the working set fits the per-generation budget.
    while vmem_needed(tm, tn, tk) > budget and (tm > 128 or tn > 128 or tk > 128):
        if tk >= max(tm, tn) and tk > 128:
            tk = _pick_tile(in_p, tk // 2)
        elif tn >= tm and tn > 128:
            tn = _pick_tile(out_p, tn // 2)
        else:
            tm = max(128, _round_up(tm // 2, 128))
    # TODO(synk): for extremely wide hidden layers (tm*hid_p / hid_p*tn alone
    # exceed the budget) the second GEMM's hid axis would also need K-tiling.

    B_p = _round_up(B, tm)
    grid = (B_p // tm, out_p // tn, in_p // tk)
    nk = grid[2]

    vmem_limit = int(min(max(vmem_needed(tm, tn, tk) + (6 << 20), 32 << 20),
                         budget))

    # Pad / cast only the activation per call (weights were prepared once).
    x_p = x
    if (B_p - B) or (in_p - in_dim):
        x_p = jnp.pad(x_p, ((0, B_p - B), (0, in_p - in_dim)))
    if x_p.dtype != compute_dtype:
        x_p = x_p.astype(compute_dtype)

    # Honest HBM traffic: W1 and W2 are re-read once per row tile.
    n_row = grid[0]
    flops = 2 * B_p * in_p * hid_p + 2 * B_p * hid_p * out_p
    bytes_accessed = (B_p * in_p * csize
                      + n_row * in_p * hid_p * csize
                      + n_row * hid_p * out_p * csize
                      + hid_p * 4 + n_row * out_p * 4
                      + B_p * out_p * osize)

    out_padded = pl.pallas_call(
        fc_block_kernel,
        out_shape=jax.ShapeDtypeStruct((B_p, out_p), out_dtype),
        grid_spec=pltpu.PrefetchScalarGridSpec(
            num_scalar_prefetch=0,
            grid=grid,
            in_specs=[
                # x row tile: constant across j/k -> one buffer is enough.
                pl.BlockSpec((tm, in_p), lambda i, j, k: (i, 0),
                             pipeline_mode=pl.Buffered(1)),
                # W1 K-slice: streamed over k on the j == 0 pass; parked on its
                # last slice for j > 0 so it is never re-fetched.
                pl.BlockSpec((tk, hid_p),
                             lambda i, j, k: (jnp.minimum(k + j * nk, nk - 1), 0)),
                # b1: constant -> single buffer.
                pl.BlockSpec((1, hid_p), lambda i, j, k: (0, 0),
                             pipeline_mode=pl.Buffered(1)),
                # W2 column tile (double-buffered: next j prefetches under the
                # current GEMMs).
                pl.BlockSpec((hid_p, tn), lambda i, j, k: (0, j)),
                pl.BlockSpec((1, tn), lambda i, j, k: (0, j)),
            ],
            out_specs=pl.BlockSpec((tm, tn), lambda i, j, k: (i, j)),
            scratch_shapes=[pltpu.VMEM((tm, hid_p), jnp.float32)],
        ),
        compiler_params=pltpu.CompilerParams(
            dimension_semantics=("parallel", "arbitrary", "arbitrary"),
            vmem_limit_bytes=vmem_limit),
        cost_estimate=pl.CostEstimate(flops=int(flops), transcendentals=0,
                                      bytes_accessed=int(bytes_accessed)),
    )(x_p, w1_p, b1_p, w2_p, b2_p)

    return out_padded[:B, :out_dim]


def fc_block(x, w1, b1, w2, b2, *, compute_dtype=jnp.bfloat16,
             tm=None, tn=None, tk=None):
    """relu((x @ w1 + b1) @ w2 + b2).

    PyTorch nn.Linear weights are (out, in); pass the transpose so the kernel
    computes x @ W directly.  For repeated calls, use prepare_fc_params() once
    and fc_block_apply() per step to avoid re-padding the weights.
    """
    params = prepare_fc_params(w1, b1, w2, b2, compute_dtype=compute_dtype)
    return fc_block_apply(params, x, tm=tm, tn=tn, tk=tk)


def fc_block_ref(x, w1, b1, w2, b2):
    h = x @ w1 + jnp.reshape(b1, (1, -1))
    y = h @ w2 + jnp.reshape(b2, (1, -1))
    return jnp.maximum(y, 0.0)


if __name__ == "__main__":
    # Small shapes consistent with FC_block(in_dim, hid_dim, out_dim).
    batch, in_dim, hid_dim, out_dim = 16, 32, 32, 16

    key = jax.random.PRNGKey(0)
    kx, kw1, kb1, kw2, kb2 = jax.random.split(key, 5)

    x = jax.random.normal(kx, (batch, in_dim), dtype=jnp.float32)
    # PyTorch nn.Linear weight is (out, in); we store the transpose.
    w1 = jax.random.normal(kw1, (in_dim, hid_dim), dtype=jnp.float32) * 0.05
    b1 = jax.random.normal(kb1, (hid_dim,), dtype=jnp.float32) * 0.05
    w2 = jax.random.normal(kw2, (hid_dim, out_dim), dtype=jnp.float32) * 0.05
    b2 = jax.random.normal(kb2, (out_dim,), dtype=jnp.float32) * 0.05

    ref = fc_block_ref(x, w1, b1, w2, b2)

    # f32 compute path: must match the reference tightly.
    out_f32 = fc_block(x, w1, b1, w2, b2, compute_dtype=jnp.float32)
    jax.block_until_ready(out_f32)
    assert out_f32.shape == (batch, out_dim)
    assert jnp.allclose(out_f32, ref, atol=1e-5, rtol=1e-5), float(
        jnp.max(jnp.abs(out_f32 - ref)))

    # Default bf16-operand path (MXU fast path), f32 accumulation: looser tol.
    out_bf16 = fc_block(x, w1, b1, w2, b2)
    jax.block_until_ready(out_bf16)
    assert out_bf16.shape == (batch, out_dim)
    assert jnp.allclose(out_bf16, ref, atol=2e-2, rtol=2e-2), float(
        jnp.max(jnp.abs(out_bf16 - ref)))

    print("KERNEL_OK")
</pallas_src>

<mosaic_0001>
module attributes {stable_mosaic.version = 11 : i64} {
  func.func @fc_block_kernel(%arg0: i32, %arg1: i32, %arg2: i32, %arg3: memref<128x128xf32, #tpu.memory_space<vmem>>, %arg4: memref<128x128xf32, #tpu.memory_space<vmem>>, %arg5: memref<1x128xf32, #tpu.memory_space<vmem>>, %arg6: memref<128x128xf32, #tpu.memory_space<vmem>>, %arg7: memref<1x128xf32, #tpu.memory_space<vmem>>, %arg8: memref<128x128xf32, #tpu.memory_space<vmem>>, %arg9: memref<128x128xf32, #tpu.memory_space<vmem>>) attributes {dimension_semantics = [#tpu.dimension_semantics<parallel>, #tpu.dimension_semantics<arbitrary>, #tpu.dimension_semantics<arbitrary>], iteration_bounds = array<i64: 1, 1, 1>, scalar_prefetch = 0 : i64, scratch_operands = 1 : i64, tpu.core_type = #tpu.core_type<tc>, window_params = [{pipeline_mode = #tpu.pipeline_mode<synchronous>, transform_indices = @transform_0, window_bounds = array<i64: 128, 128>}, {transform_indices = @transform_1, window_bounds = array<i64: 128, 128>}, {pipeline_mode = #tpu.pipeline_mode<synchronous>, transform_indices = @transform_2, window_bounds = array<i64: 1, 128>}, {transform_indices = @transform_3, window_bounds = array<i64: 128, 128>}, {transform_indices = @transform_4, window_bounds = array<i64: 1, 128>}, {transform_indices = @transform_5, window_bounds = array<i64: 128, 128>}]} {
    %c0_i32 = arith.constant 0 : i32
    %0 = arith.cmpi eq, %arg1, %c0_i32 : i32
    %c0_i32_0 = arith.constant 0 : i32
    %1 = arith.cmpi eq, %arg2, %c0_i32_0 : i32
    %2 = arith.andi %0, %1 : i1
    %3 = arith.extui %2 : i1 to i32
    %c0_i32_1 = arith.constant 0 : i32
    %4 = arith.cmpi ne, %3, %c0_i32_1 : i32
    scf.if %4 {
      %c0 = arith.constant 0 : index
      %c0_6 = arith.constant 0 : index
      %11 = vector.load %arg5[%c0, %c0_6] : memref<1x128xf32, #tpu.memory_space<vmem>>, vector<1x128xf32>
      %12 = vector.shape_cast %11 : vector<1x128xf32> to vector<1x128xf32>
      %13 = vector.broadcast %12 : vector<1x128xf32> to vector<128x128xf32>
      %c0_7 = arith.constant 0 : index
      %c0_8 = arith.constant 0 : index
      %14 = vector.load %arg9[%c0_7, %c0_8] : memref<128x128xf32, #tpu.memory_space<vmem>>, vector<128x128xf32>
      tpu.vector_store %arg9[%c0_7, %c0_8], %13 {strides = array<i32>} : memref<128x128xf32, #tpu.memory_space<vmem>>, vector<128x128xf32>,
    } else {
    }
    %c0_i32_2 = arith.constant 0 : i32
    %5 = arith.cmpi eq, %arg1, %c0_i32_2 : i32
    %6 = arith.extui %5 : i1 to i32
    %c0_i32_3 = arith.constant 0 : i32
    %7 = arith.cmpi ne, %6, %c0_i32_3 : i32
    scf.if %7 {
      %c128_i32 = arith.constant 128 : i32
      %11 = arith.muli %arg2, %c128_i32 : i32
      %12 = tpu.assume_multiple %11, 128 : i32
      %c0 = arith.constant 0 : index
      %13 = arith.index_cast %12 : i32 to index
      %14 = vector.load %arg3[%c0, %13] : memref<128x128xf32, #tpu.memory_space<vmem>>, vector<128x128xf32>
      %c0_6 = arith.constant 0 : index
      %c0_7 = arith.constant 0 : index
      %15 = vector.load %arg9[%c0_6, %c0_7] : memref<128x128xf32, #tpu.memory_space<vmem>>, vector<128x128xf32>
      %c0_8 = arith.constant 0 : index
      %c0_9 = arith.constant 0 : index
      %16 = vector.load %arg4[%c0_8, %c0_9] : memref<128x128xf32, #tpu.memory_space<vmem>>, vector<128x128xf32>
      %cst = arith.constant dense<0.000000e+00> : vector<128x128xf32>
      %17 = tpu.matmul %14, %16, %cst {dimension_numbers = #tpu.dot_dimension_numbers<[1], [0], [0], [1], [0, 0, 1, 1], [], []>} : vector<128x128xf32>, vector<128x128xf32>, vector<128x128xf32> -> vector<128x128xf32>
      %18 = arith.addf %15, %17 : vector<128x128xf32>
      %c0_10 = arith.constant 0 : index
      %c0_11 = arith.constant 0 : index
      %19 = vector.load %arg9[%c0_10, %c0_11] : memref<128x128xf32, #tpu.memory_space<vmem>>, vector<128x128xf32>
      tpu.vector_store %arg9[%c0_10, %c0_11], %18 {strides = array<i32>} : memref<128x128xf32, #tpu.memory_space<vmem>>, vector<128x128xf32>,
    } else {
    }
    %c0_i32_4 = arith.constant 0 : i32
    %8 = arith.cmpi eq, %arg2, %c0_i32_4 : i32
    %9 = arith.extui %8 : i1 to i32
    %c0_i32_5 = arith.constant 0 : i32
    %10 = arith.cmpi ne, %9, %c0_i32_5 : i32
    scf.if %10 {
      %c0 = arith.constant 0 : index
      %c0_6 = arith.constant 0 : index
      %11 = vector.load %arg9[%c0, %c0_6] : memref<128x128xf32, #tpu.memory_space<vmem>>, vector<128x128xf32>
      %c0_7 = arith.constant 0 : index
      %c0_8 = arith.constant 0 : index
      %12 = vector.load %arg6[%c0_7, %c0_8] : memref<128x128xf32, #tpu.memory_space<vmem>>, vector<128x128xf32>
      %cst = arith.constant dense<0.000000e+00> : vector<128x128xf32>
      %13 = tpu.matmul %11, %12, %cst {dimension_numbers = #tpu.dot_dimension_numbers<[1], [0], [0], [1], [0, 0, 1, 1], [], []>} : vector<128x128xf32>, vector<128x128xf32>, vector<128x128xf32> -> vector<128x128xf32>
      %c0_9 = arith.constant 0 : index
      %c0_10 = arith.constant 0 : index
      %14 = vector.load %arg7[%c0_9, %c0_10] : memref<1x128xf32, #tpu.memory_space<vmem>>, vector<1x128xf32>
      %15 = vector.broadcast %14 : vector<1x128xf32> to vector<128x128xf32>
      %16 = arith.addf %13, %15 : vector<128x128xf32>
      %cst_11 = arith.constant 0.000000e+00 : f32
      %17 = vector.broadcast %cst_11 : f32 to vector<128x128xf32>
      %18 = arith.maximumf %16, %17 : vector<128x128xf32>
      %c0_12 = arith.constant 0 : index
      %c0_13 = arith.constant 0 : index
      %19 = vector.load %arg8[%c0_12, %c0_13] : memref<128x128xf32, #tpu.memory_space<vmem>>, vector<128x128xf32>
      tpu.vector_store %arg8[%c0_12, %c0_13], %18 {strides = array<i32>} : memref<128x128xf32, #tpu.memory_space<vmem>>, vector<128x128xf32>,
    } else {
    }
    return
  }
  func.func @transform_0(%arg0: i32, %arg1: i32, %arg2: i32) -> (i32, i32) {
    %c0_i32 = arith.constant 0 : i32
    %c0_i32_0 = arith.constant 0 : i32
    return %arg0, %c0_i32 : i32, i32
  }
  func.func @transform_1(%arg0: i32, %arg1: i32, %arg2: i32) -> (i32, i32) {
    %c1_i32 = arith.constant 1 : i32
    %0 = arith.muli %arg1, %c1_i32 : i32
    %1 = arith.addi %arg2, %0 : i32
    %c0_i32 = arith.constant 0 : i32
    %2 = arith.minsi %1, %c0_i32 : i32
    %c0_i32_0 = arith.constant 0 : i32
    %c0_i32_1 = arith.constant 0 : i32
    return %2, %c0_i32_0 : i32, i32
  }
  func.func @transform_2(%arg0: i32, %arg1: i32, %arg2: i32) -> (i32, i32) {
    %c0_i32 = arith.constant 0 : i32
    %c0_i32_0 = arith.constant 0 : i32
    %c0_i32_1 = arith.constant 0 : i32
    return %c0_i32, %c0_i32_0 : i32, i32
  }
  func.func @transform_3(%arg0: i32, %arg1: i32, %arg2: i32) -> (i32, i32) {
    %c0_i32 = arith.constant 0 : i32
    %c0_i32_0 = arith.constant 0 : i32
    return %c0_i32, %arg1 : i32, i32
  }
  func.func @transform_4(%arg0: i32, %arg1: i32, %arg2: i32) -> (i32, i32) {
    %c0_i32 = arith.constant 0 : i32
    %c0_i32_0 = arith.constant 0 : i32
    return %c0_i32, %arg1 : i32, i32
  }
  func.func @transform_5(%arg0: i32, %arg1: i32, %arg2: i32) -> (i32, i32) {
    %c0_i32 = arith.constant 0 : i32
    return %arg0, %arg1 : i32, i32
  }
}

</mosaic_0001>

<bundles_post_ra>
// kernel: tpu_custom_call.1
= control target key start
LH: loop header
LB: loop body
LE: loop exit
PB: predicated region body
PF: predicated region fallthrough
CT: control target
= control target key end

     0   :  { %10 = vsyncpa [#allocation4], 0  ;;  %s641_s0 = inlined_call_operand.hbm [shape: f32[128,128], index: 0, kind: input, shape index: {}]   ;;  %s642_s1 = inlined_call_operand.hbm [shape: f32[128,128], index: 1, kind: input, shape index: {}]   ;;  %s643_s2 = inlined_call_operand.vmem [shape: f32[1,128], index: 2, kind: input, shape index: {}]   ;;  %s644_s3 = inlined_call_operand.hbm [shape: f32[128,128], index: 3, kind: input, shape index: {}]   ;;  %s645_s4 = inlined_call_operand.vmem [shape: f32[1,128], index: 4, kind: input, shape index: {}]   ;;  %s646_s5 = inlined_call_operand.hbm [shape: f32[128,128], index: 5, kind: output, shape index: {}]  }
   0x1   :  { %11 = vsyncpa [#allocation7], 0 }
   0x2   :  { %12 = vsyncpa [#allocation5], 0  ;;  %s36_s20 = sshll.u32 %s642_s1, 4  ;;  %s557_s21 = smov [#allocation6]   ;;  %s37_s20 = int_to_ptr.hbm [resolvable:$true] %s36_s20 }
   0x3   :  { %s38_s22 = sshll.u32 %s557_s21, 4  ;;  %s17_s25 = sshll.u32 %s641_s0, 4  ;;  %s39_s22 = int_to_ptr.vmem [resolvable:$true] %s38_s22  ;;  %s18_s25 = int_to_ptr.hbm [resolvable:$true] %s17_s25 }
   0x4   :  { %s558_s26 = smov 128   ;;  %s559_s27 = smov 8  }
   0x5   :  { %44 = dma.hbm_to_vmem [thread:$0]  %s37_s20, 2048, %s39_s22, [#allocation7], %s558_s26, %s558_s26, %s559_s27  }
   0x6   :  { %s560_s28 = smov [#allocation3]   ;;  %s51_s1 = sshll.u32 %s644_s3, 4  ;;  %s52_s1 = int_to_ptr.hbm [resolvable:$true] %s51_s1 }
   0x7   :  { %s19_s29 = sshll.u32 %s560_s28, 4  ;;  %s561_s0 = smov [#allocation8]   ;;  %s20_s29 = int_to_ptr.vmem [resolvable:$true] %s19_s29 }
   0x8   :  { %25 = dma.hbm_to_vmem [thread:$0]  %s18_s25, 2048, %s20_s29, [#allocation4], %s558_s26, %s558_s26, %s559_s27  }
   0x9   :  { %s53_s7 = sshll.u32 %s561_s0, 4  ;;  %s54_s7 = int_to_ptr.vmem [resolvable:$true] %s53_s7 }
   0xa   :  { %59 = dma.hbm_to_vmem [thread:$0]  %s52_s1, 2048, %s54_s7, [#allocation7], %s558_s26, %s558_s26, %s559_s27  }
   0xb   :  { %551 = dma.done.wait [#allocation4], 2048  }
   0xc   :  { %552 = vsyncadd [#allocation4], 4294965248 }
   0xd   :  { %553 = dma.done.wait [#allocation7], 4096  }
   0xe   :  { %554 = vsyncadd [#allocation7], 4294963200  ;;  %v158_v0 = vld [vmem:[#allocation6 + $0x78] sm:$0xff]  ;;  %v157_v1 = vld [vmem:[#allocation6 + $0x70] sm:$0xff]  ;;  %s398_s13 = sshll.u32 %s646_s5, 4  ;;  %s399_s13 = int_to_ptr.hbm [resolvable:$true] %s398_s13 }
   0xf   :  { %415 = vmatpush.msra.mxu2 %v158_v0  ;;  %159 = vmatpush.msra.mxu0 %v158_v0  ;;  %v156_v2 = vld [vmem:[#allocation6 + $0x68] sm:$0xff]  ;;  %v155_v3 = vld [vmem:[#allocation6 + $0x60] sm:$0xff]  ;;  %v154_v4 = vld [vmem:[#allocation6 + $0x58] sm:$0xff] }
  0x10   :  { %v153_v5 = vld [vmem:[#allocation6 + $0x50] sm:$0xff]  ;;  %v152_v6 = vld [vmem:[#allocation6 + $0x48] sm:$0xff]  ;;  %v151_v7 = vld [vmem:[#allocation6 + $0x40] sm:$0xff] }
  0x11   :  { %416 = vmatpush.msra.mxu2 %v157_v1  ;;  %160 = vmatpush.msra.mxu0 %v157_v1  ;;  %v150_v8 = vld [vmem:[#allocation6 + $0x38] sm:$0xff]  ;;  %v149_v9 = vld [vmem:[#allocation6 + $0x30] sm:$0xff]  ;;  %v148_v10 = vld [vmem:[#allocation6 + $0x28] sm:$0xff] }
  0x12   :  { %v147_v11 = vld [vmem:[#allocation6 + $0x20] sm:$0xff]  ;;  %v146_v12 = vld [vmem:[#allocation6 + $0x18] sm:$0xff]  ;;  %v145_v13 = vld [vmem:[#allocation6 + $0x10] sm:$0xff] }
  0x13   :  { %417 = vmatpush.msra.mxu2 %v156_v2  ;;  %161 = vmatpush.msra.mxu0 %v156_v2  ;;  %v144_v14 = vld [vmem:[#allocation6 + $0x8] sm:$0xff]  ;;  %v143_v15 = vld [vmem:[#allocation6] sm:$0xff]  ;;  %v121_v20 = vld [vmem:[#allocation3 + $0x50] sm:$0xff] }
  0x14   :  { %v119_v16 = vld [vmem:[#allocation3 + $0x40] sm:$0xff]  ;;  %v120_v18 = vld [vmem:[#allocation3 + $0x48] sm:$0xff]  ;;  %v113_v21 = vld [vmem:[#allocation3 + $0x10] sm:$0xff] }
  0x15   :  { %418 = vmatpush.msra.mxu2 %v155_v3  ;;  %162 = vmatpush.msra.mxu0 %v155_v3  ;;  %v111_v17 = vld [vmem:[#allocation3] sm:$0xff]  ;;  %v112_v19 = vld [vmem:[#allocation3 + $0x8] sm:$0xff]  ;;  %v122_v22 = vld [vmem:[#allocation3 + $0x58] sm:$0xff] }
  0x16   :  { %v114_v23 = vld [vmem:[#allocation3 + $0x18] sm:$0xff]  ;;  %v289_v25 = vld [vmem:[#allocation8 + $0x70] sm:$0xff]  ;;  %v288_v26 = vld [vmem:[#allocation8 + $0x68] sm:$0xff] }
  0x17   :  { %419 = vmatpush.msra.mxu2 %v154_v4  ;;  %163 = vmatpush.msra.mxu0 %v154_v4  ;;  %v290_v24 = vld [vmem:[#allocation8 + $0x78] sm:$0xff]  ;;  %v287_v27 = vld [vmem:[#allocation8 + $0x60] sm:$0xff]  ;;  %v285_v31 = vld [vmem:[#allocation8 + $0x50] sm:$0xff] }
  0x18   :  { %431 = vmatpush.msra.mxu3 %v290_v24  ;;  %295 = vmatpush.msra.mxu1 %v290_v24  ;;  %v123_v28 = vld [vmem:[#allocation3 + $0x60] sm:$0xff]  ;;  %v286_v30 = vld [vmem:[#allocation8 + $0x58] sm:$0xff]  ;;  %v284_v32 = vld [vmem:[#allocation8 + $0x48] sm:$0xff] }
  0x19   :  { %420 = vmatpush.msra.mxu2 %v153_v5  ;;  %164 = vmatpush.msra.mxu0 %v153_v5  ;;  %v115_v29 = vld [vmem:[#allocation3 + $0x20] sm:$0xff]  ;;  %v124_v34 = vld [vmem:[#allocation3 + $0x68] sm:$0xff]  ;;  %v282_v36 = vld [vmem:[#allocation8 + $0x38] sm:$0xff] }
  0x1a   :  { %432 = vmatpush.msra.mxu3 %v289_v25  ;;  %296 = vmatpush.msra.mxu1 %v289_v25  ;;  %v283_v33 = vld [vmem:[#allocation8 + $0x40] sm:$0xff]  ;;  %v116_v35 = vld [vmem:[#allocation3 + $0x28] sm:$0xff]  ;;  %v281_v37 = vld [vmem:[#allocation8 + $0x30] sm:$0xff] }
  0x1b   :  { %421 = vmatpush.msra.mxu2 %v152_v6  ;;  %165 = vmatpush.msra.mxu0 %v152_v6  ;;  %v280_v38 = vld [vmem:[#allocation8 + $0x28] sm:$0xff]  ;;  %v279_v39 = vld [vmem:[#allocation8 + $0x20] sm:$0xff]  ;;  %v125_v40 = vld [vmem:[#allocation3 + $0x70] sm:$0xff] }
  0x1c   :  { %433 = vmatpush.msra.mxu3 %v288_v26  ;;  %297 = vmatpush.msra.mxu1 %v288_v26  ;;  %v117_v41 = vld [vmem:[#allocation3 + $0x30] sm:$0xff]  ;;  %v278_v42 = vld [vmem:[#allocation8 + $0x18] sm:$0xff]  ;;  %v276_v46 = vld [vmem:[#allocation8 + $0x8] sm:$0xff] }
  0x1d   :  { %422 = vmatpush.msra.mxu2 %v151_v7  ;;  %166 = vmatpush.msra.mxu0 %v151_v7  ;;  %v277_v43 = vld [vmem:[#allocation8 + $0x10] sm:$0xff]  ;;  %v126_v44 = vld [vmem:[#allocation3 + $0x78] sm:$0xff]  ;;  %v275_v47 = vld [vmem:[#allocation8] sm:$0xff] }
  0x1e   :  { %434 = vmatpush.msra.mxu3 %v287_v27  ;;  %298 = vmatpush.msra.mxu1 %v287_v27  ;;  %v118_v45 = vld [vmem:[#allocation3 + $0x38] sm:$0xff]  ;;  %v453_v48 = vld [vmem:[%s643_s2] ss:$0 sm:$0xff] }
  0x1f   :  { %423 = vmatpush.msra.mxu2 %v150_v8  ;;  %167 = vmatpush.msra.mxu0 %v150_v8 }
  0x20   :  { %435 = vmatpush.msra.mxu3 %v286_v30  ;;  %299 = vmatpush.msra.mxu1 %v286_v30 }
  0x21   :  { %424 = vmatpush.msra.mxu2 %v149_v9  ;;  %168 = vmatpush.msra.mxu0 %v149_v9 }
  0x22   :  { %436 = vmatpush.msra.mxu3 %v285_v31  ;;  %300 = vmatpush.msra.mxu1 %v285_v31 }
  0x23   :  { %425 = vmatpush.msra.mxu2 %v148_v10  ;;  %169 = vmatpush.msra.mxu0 %v148_v10 }
  0x24   :  { %437 = vmatpush.msra.mxu3 %v284_v32  ;;  %301 = vmatpush.msra.mxu1 %v284_v32 }
  0x25   :  { %426 = vmatpush.msra.mxu2 %v147_v11  ;;  %170 = vmatpush.msra.mxu0 %v147_v11 }
  0x26   :  { %438 = vmatpush.msra.mxu3 %v283_v33  ;;  %302 = vmatpush.msra.mxu1 %v283_v33 }
  0x27   :  { %427 = vmatpush.msra.mxu2 %v146_v12  ;;  %171 = vmatpush.msra.mxu0 %v146_v12 }
  0x28   :  { %439 = vmatpush.msra.mxu3 %v282_v36  ;;  %303 = vmatpush.msra.mxu1 %v282_v36 }
  0x29   :  { %428 = vmatpush.msra.mxu2 %v145_v13  ;;  %172 = vmatpush.msra.mxu0 %v145_v13 }
  0x2a   :  { %440 = vmatpush.msra.mxu3 %v281_v37  ;;  %304 = vmatpush.msra.mxu1 %v281_v37 }
  0x2b   :  { %429 = vmatpush.msra.mxu2 %v144_v14  ;;  %173 = vmatpush.msra.mxu0 %v144_v14 }
  0x2c   :  { %441 = vmatpush.msra.mxu3 %v280_v38  ;;  %305 = vmatpush.msra.mxu1 %v280_v38 }
  0x2d   :  { %430 = vmatpush.msra.mxu2 %v143_v15  ;;  %174 = vmatpush.msra.mxu0 %v143_v15 }
  0x2e   :  { %199 = vmatmul.f32.vlgmr.msra.gmra.mxu2 %v119_v16  ;;  %175 = vmatmul.f32.vlgmr.msra.gmra.mxu0 %v111_v17  ;;  %v617_v17 = vld [vmem:[%s645_s4] ss:$0 sm:$0xff]  ;;  %s562_s4 = smov [#allocation9]  }
  0x2f   :  { %442 = vmatpush.msra.mxu3 %v279_v39  ;;  %306 = vmatpush.msra.mxu1 %v279_v39  ;;  %s396_s10 = sshll.u32 %s562_s4, 4  ;;  %s397_s10 = int_to_ptr.vmem [resolvable:$true] %s396_s10 }
  0x31   :  { %443 = vmatpush.msra.mxu3 %v278_v42  ;;  %307 = vmatpush.msra.mxu1 %v278_v42 }
  0x33   :  { %444 = vmatpush.msra.mxu3 %v277_v43  ;;  %308 = vmatpush.msra.mxu1 %v277_v43 }
  0x35   :  { %445 = vmatpush.msra.mxu3 %v276_v46  ;;  %309 = vmatpush.msra.mxu1 %v276_v46 }
  0x36   :  { %202 = vmatmul.f32.gmra.mxu2 %v120_v18  ;;  %178 = vmatmul.f32.gmra.mxu0 %v112_v19 }
  0x37   :  { %446 = vmatpush.msra.mxu3 %v275_v47  ;;  %310 = vmatpush.msra.mxu1 %v275_v47 }
  0x3e   :  { %205 = vmatmul.f32.gmra.mxu2 %v121_v20  ;;  %181 = vmatmul.f32.gmra.mxu0 %v113_v21 }
  0x46   :  { %208 = vmatmul.f32.gmra.mxu2 %v122_v22  ;;  %184 = vmatmul.f32.gmra.mxu0 %v114_v23 }
  0x4e   :  { %211 = vmatmul.f32.gmra.mxu2 %v123_v28  ;;  %187 = vmatmul.f32.gmra.mxu0 %v115_v29 }
  0x56   :  { %214 = vmatmul.f32.gmra.mxu2 %v124_v34  ;;  %190 = vmatmul.f32.gmra.mxu0 %v116_v35 }
  0x5e   :  { %217 = vmatmul.f32.gmra.mxu2 %v125_v40  ;;  %193 = vmatmul.f32.gmra.mxu0 %v117_v41 }
  0x66   :  { %220 = vmatmul.f32.gmra.mxu2 %v126_v44  ;;  %196 = vmatmul.f32.gmra.mxu0 %v118_v45 }
  0xab   :  { %v176_v49 = vpop.f32.mrf.mxu0 }
  0xac   :  { %v224_v50 = vadd.f32 %v453_v48, %v176_v49 }
  0xae   :  { %311 = vmatmul.f32.vlgmr.msra.gmra.mxu1 %v224_v50 }
  0xb1   :  { %v200_v51 = vpop.f32.mrf.mxu2 }
  0xb2   :  { %v232_v52 = vadd.f32 %v453_v48, %v200_v51 }
  0xb3   :  { %v179_v53 = vpop.f32.mrf.mxu0 }
  0xb4   :  { %335 = vmatmul.f32.vlgmr.msra.gmra.mxu3 %v232_v52  ;;  %v225_v54 = vadd.f32 %v453_v48, %v179_v53 }
  0xb6   :  { %314 = vmatmul.f32.gmra.mxu1 %v225_v54 }
  0xb9   :  { %v203_v55 = vpop.f32.mrf.mxu2 }
  0xba   :  { %v233_v56 = vadd.f32 %v453_v48, %v203_v55 }
  0xbb   :  { %v182_v57 = vpop.f32.mrf.mxu0 }
  0xbc   :  { %338 = vmatmul.f32.gmra.mxu3 %v233_v56  ;;  %v226_v58 = vadd.f32 %v453_v48, %v182_v57 }
  0xbe   :  { %317 = vmatmul.f32.gmra.mxu1 %v226_v58 }
  0xc1   :  { %v206_v59 = vpop.f32.mrf.mxu2 }
  0xc2   :  { %v234_v60 = vadd.f32 %v453_v48, %v206_v59 }
  0xc3   :  { %v185_v61 = vpop.f32.mrf.mxu0 }
  0xc4   :  { %341 = vmatmul.f32.gmra.mxu3 %v234_v60  ;;  %v227_v62 = vadd.f32 %v453_v48, %v185_v61 }
  0xc6   :  { %320 = vmatmul.f32.gmra.mxu1 %v227_v62 }
  0xc9   :  { %v209_v63 = vpop.f32.mrf.mxu2 }
  0xca   :  { %v235_v0 = vadd.f32 %v453_v48, %v209_v63 }
  0xcb   :  { %v188_v1 = vpop.f32.mrf.mxu0 }
  0xcc   :  { %344 = vmatmul.f32.gmra.mxu3 %v235_v0  ;;  %v228_v2 = vadd.f32 %v453_v48, %v188_v1 }
  0xce   :  { %323 = vmatmul.f32.gmra.mxu1 %v228_v2 }
  0xd1   :  { %v212_v3 = vpop.f32.mrf.mxu2 }
  0xd2   :  { %v236_v4 = vadd.f32 %v453_v48, %v212_v3 }
  0xd3   :  { %v191_v5 = vpop.f32.mrf.mxu0 }
  0xd4   :  { %347 = vmatmul.f32.gmra.mxu3 %v236_v4  ;;  %v229_v6 = vadd.f32 %v453_v48, %v191_v5 }
  0xd6   :  { %326 = vmatmul.f32.gmra.mxu1 %v229_v6 }
  0xd9   :  { %v215_v7 = vpop.f32.mrf.mxu2 }
  0xda   :  { %v237_v8 = vadd.f32 %v453_v48, %v215_v7 }
  0xdb   :  { %v194_v9 = vpop.f32.mrf.mxu0 }
  0xdc   :  { %350 = vmatmul.f32.gmra.mxu3 %v237_v8  ;;  %v230_v10 = vadd.f32 %v453_v48, %v194_v9 }
  0xde   :  { %329 = vmatmul.f32.gmra.mxu1 %v230_v10 }
  0xe1   :  { %v218_v11 = vpop.f32.mrf.mxu2 }
  0xe2   :  { %v238_v12 = vadd.f32 %v453_v48, %v218_v11 }
  0xe3   :  { %v197_v13 = vpop.f32.mrf.mxu0 }
  0xe4   :  { %353 = vmatmul.f32.gmra.mxu3 %v238_v12  ;;  %v231_v14 = vadd.f32 %v453_v48, %v197_v13 }
  0xe6   :  { %332 = vmatmul.f32.gmra.mxu1 %v231_v14 }
  0xe9   :  { %v221_v15 = vpop.f32.mrf.mxu2 }
  0xea   :  { %v239_v16 = vadd.f32 %v453_v48, %v221_v15 }
  0xec   :  { %356 = vmatmul.f32.gmra.mxu3 %v239_v16 }
 0x12b   :  { %v312_v18 = vpop.f32.mrf.mxu1 }
 0x12c   :  { %v313_v19 = vadd.f32 %v617_v17, %v312_v18 }
 0x12e   :  { %v360_v20 = vmax.f32 %v313_v19, 0.0 }
 0x130   :  { %376 = vst [vmem:[#allocation9] sm:$0xff] %v360_v20 }
 0x133   :  { %v315_v21 = vpop.f32.mrf.mxu1 }
 0x134   :  { %v316_v22 = vadd.f32 %v617_v17, %v315_v21 }
 0x136   :  { %v361_v23 = vmax.f32 %v316_v22, 0.0 }
 0x137   :  { %v336_v24 = vpop.f32.mrf.mxu3 }
 0x138   :  { %v337_v25 = vadd.f32 %v617_v17, %v336_v24  ;;  %377 = vst [vmem:[#allocation9 + $0x8] sm:$0xff] %v361_v23 }
 0x13a   :  { %v368_v26 = vmax.f32 %v337_v25, 0.0 }
 0x13b   :  { %v318_v27 = vpop.f32.mrf.mxu1 }
 0x13c   :  { %384 = vst [vmem:[#allocation9 + $0x40] sm:$0xff] %v368_v26  ;;  %v319_v28 = vadd.f32 %v617_v17, %v318_v27 }
 0x13e   :  { %v362_v29 = vmax.f32 %v319_v28, 0.0 }
 0x13f   :  { %v339_v30 = vpop.f32.mrf.mxu3 }
 0x140   :  { %v340_v31 = vadd.f32 %v617_v17, %v339_v30  ;;  %378 = vst [vmem:[#allocation9 + $0x10] sm:$0xff] %v362_v29 }
 0x142   :  { %v369_v32 = vmax.f32 %v340_v31, 0.0 }
 0x143   :  { %v321_v33 = vpop.f32.mrf.mxu1 }
 0x144   :  { %385 = vst [vmem:[#allocation9 + $0x48] sm:$0xff] %v369_v32  ;;  %v322_v34 = vadd.f32 %v617_v17, %v321_v33 }
 0x146   :  { %v363_v35 = vmax.f32 %v322_v34, 0.0 }
 0x147   :  { %v342_v36 = vpop.f32.mrf.mxu3 }
 0x148   :  { %v343_v37 = vadd.f32 %v617_v17, %v342_v36  ;;  %379 = vst [vmem:[#allocation9 + $0x18] sm:$0xff] %v363_v35 }
 0x14a   :  { %v370_v38 = vmax.f32 %v343_v37, 0.0 }
 0x14b   :  { %v324_v39 = vpop.f32.mrf.mxu1 }
 0x14c   :  { %386 = vst [vmem:[#allocation9 + $0x50] sm:$0xff] %v370_v38  ;;  %v325_v40 = vadd.f32 %v617_v17, %v324_v39 }
 0x14e   :  { %v364_v41 = vmax.f32 %v325_v40, 0.0 }
 0x14f   :  { %v345_v42 = vpop.f32.mrf.mxu3 }
 0x150   :  { %v346_v43 = vadd.f32 %v617_v17, %v345_v42  ;;  %380 = vst [vmem:[#allocation9 + $0x20] sm:$0xff] %v364_v41 }
 0x152   :  { %v371_v44 = vmax.f32 %v346_v43, 0.0 }
 0x153   :  { %v327_v45 = vpop.f32.mrf.mxu1 }
 0x154   :  { %387 = vst [vmem:[#allocation9 + $0x58] sm:$0xff] %v371_v44  ;;  %v328_v46 = vadd.f32 %v617_v17, %v327_v45 }
 0x156   :  { %v365_v47 = vmax.f32 %v328_v46, 0.0 }
 0x157   :  { %v348_v48 = vpop.f32.mrf.mxu3 }
 0x158   :  { %v349_v49 = vadd.f32 %v617_v17, %v348_v48  ;;  %381 = vst [vmem:[#allocation9 + $0x28] sm:$0xff] %v365_v47 }
 0x15a   :  { %v372_v50 = vmax.f32 %v349_v49, 0.0 }
 0x15b   :  { %v330_v51 = vpop.f32.mrf.mxu1 }
 0x15c   :  { %388 = vst [vmem:[#allocation9 + $0x60] sm:$0xff] %v372_v50  ;;  %v331_v52 = vadd.f32 %v617_v17, %v330_v51 }
 0x15e   :  { %v366_v53 = vmax.f32 %v331_v52, 0.0 }
 0x15f   :  { %v351_v54 = vpop.f32.mrf.mxu3 }
 0x160   :  { %v352_v55 = vadd.f32 %v617_v17, %v351_v54  ;;  %382 = vst [vmem:[#allocation9 + $0x30] sm:$0xff] %v366_v53 }
 0x162   :  { %v373_v56 = vmax.f32 %v352_v55, 0.0 }
 0x163   :  { %v333_v57 = vpop.f32.mrf.mxu1 }
 0x164   :  { %389 = vst [vmem:[#allocation9 + $0x68] sm:$0xff] %v373_v56  ;;  %v334_v58 = vadd.f32 %v617_v17, %v333_v57 }
 0x166   :  { %v367_v59 = vmax.f32 %v334_v58, 0.0 }
 0x167   :  { %v354_v60 = vpop.f32.mrf.mxu3 }
 0x168   :  { %v355_v61 = vadd.f32 %v617_v17, %v354_v60  ;;  %383 = vst [vmem:[#allocation9 + $0x38] sm:$0xff] %v367_v59 }
 0x16a   :  { %v374_v62 = vmax.f32 %v355_v61, 0.0 }
 0x16c   :  { %390 = vst [vmem:[#allocation9 + $0x70] sm:$0xff] %v374_v62 }
 0x16f   :  { %v357_v63 = vpop.f32.mrf.mxu3 }
 0x170   :  { %v358_v0 = vadd.f32 %v617_v17, %v357_v63 }
 0x172   :  { %v375_v1 = vmax.f32 %v358_v0, 0.0 }
 0x174   :  { %391 = vst [vmem:[#allocation9 + $0x78] sm:$0xff] %v375_v1 }
 0x175   :  { %404 = dma.vmem_to_hbm [thread:$0]  %s397_s10, 2048, %s399_s13, [#allocation5], %s558_s26, %s558_s26, %s559_s27  }
 0x176   :  { %555 = dma.done.wait [#allocation5], 2048  }
 0x177   :  { %556 = vsyncadd [#allocation5], 4294965248 }
 0x178   :  { %409 = vsyncpa [#allocation4], 1 }
 0x179   :  { %410 = vsyncpa [#allocation7], 1 }
 0x17a   :  { %411 = vsyncpa [#allocation5], 1 }

</bundles_post_ra>
